<compile_context>
chip_gen: v5e
topology: v5e:2x2
jax: 0.10.0
libtpu: 0.0.40
codegen_flags: <defaults>
</compile_context>

<pallas_src>
import jax
import jax.numpy as jnp
from jax.experimental import pallas as pl
from jax.experimental.pallas import tpu as pltpu

_LANE = 128


def _mlp_kernel(obs_ref, w1_ref, b1_ref, w2_ref, b2_ref, w3_ref, b3_ref, out_ref):
    """All agents' 3-layer MLPs in a single invocation (static unroll over A)."""
    n_agents = obs_ref.shape[0]
    for a in range(n_agents):  # A is tiny & static -> full unroll
        x = obs_ref[a]  # (B, D_in) bf16
        h1 = jnp.dot(x, w1_ref[a], preferred_element_type=jnp.float32) + b1_ref[a]
        h1 = jnp.maximum(h1, 0.0)  # f32 epilogue on VPU
        h2 = jnp.dot(h1.astype(jnp.bfloat16), w2_ref[a],
                     preferred_element_type=jnp.float32) + b2_ref[a]
        h2 = jnp.maximum(h2, 0.0)
        q = jnp.dot(h2.astype(jnp.bfloat16), w3_ref[a],
                    preferred_element_type=jnp.float32) + b3_ref[a]
        out_ref[a] = q.astype(out_ref.dtype)  # lane-dense (padded to 128) store


def qnetwork_forward(obs_stacked, params):
    """obs_stacked: (A, B, D_in) float32  ->  (A, B, D_out) float32."""
    w1, b1, w2, b2, w3, b3 = params
    A, B, D_in = obs_stacked.shape
    H = w1.shape[-1]
    D_out = w3.shape[-1]

    # Pad the output head to a full 128-lane slab so the writeback is an
    # unmasked, lane-dense store (zero-padded columns are sliced off below).
    D_pad = max(_LANE, ((D_out + _LANE - 1) // _LANE) * _LANE)
    pad = D_pad - D_out

    # Cast matmul operands to bf16 ONCE at the wrapper (MXU-native on v6e/v7x,
    # halves weight bytes everywhere). Biases stay f32 (added post-accumulate).
    obs_bf = obs_stacked.astype(jnp.bfloat16)
    w1_bf = w1.astype(jnp.bfloat16)
    w2_bf = w2.astype(jnp.bfloat16)
    w3_bf = jnp.pad(w3, ((0, 0), (0, 0), (0, pad))).astype(jnp.bfloat16)
    b3_p = jnp.pad(b3, ((0, 0), (0, 0), (0, pad)))  # f32

    vmem = pl.BlockSpec(memory_space=pltpu.MemorySpace.VMEM)

    out = pl.pallas_call(
        _mlp_kernel,
        out_shape=jax.ShapeDtypeStruct((A, B, D_pad), jnp.float32),
        in_specs=[vmem] * 7,   # whole arrays resident in VMEM, no grid
        out_specs=vmem,
    )(obs_bf, w1_bf, b1, w2_bf, b2, w3_bf, b3_p)

    return out[:, :, :D_out]


def init_params(key, n_agents, joint_obs_dim, hidden_dim, action_dim):
    """Deterministic synthetic init (PyTorch-Linear-like uniform fan-in)."""
    ks = jax.random.split(key, 6)

    def unif(k, shape, fan_in):
        bound = 1.0 / jnp.sqrt(fan_in)
        return jax.random.uniform(k, shape, jnp.float32, -bound, bound)

    w1 = unif(ks[0], (n_agents, joint_obs_dim, hidden_dim), joint_obs_dim)
    b1 = unif(ks[1], (n_agents, 1, hidden_dim), joint_obs_dim)
    w2 = unif(ks[2], (n_agents, hidden_dim, hidden_dim), hidden_dim)
    b2 = unif(ks[3], (n_agents, 1, hidden_dim), hidden_dim)
    w3 = unif(ks[4], (n_agents, hidden_dim, action_dim), hidden_dim)
    b3 = unif(ks[5], (n_agents, 1, action_dim), hidden_dim)
    return (w1, b1, w2, b2, w3, b3)


def reference_forward(obs_stacked, params):
    w1, b1, w2, b2, w3, b3 = params
    h1 = jnp.maximum(jnp.einsum("abd,adh->abh", obs_stacked, w1) + b1, 0.0)
    h2 = jnp.maximum(jnp.einsum("abh,ahk->abk", h1, w2) + b2, 0.0)
    return jnp.einsum("abh,ahk->abk", h2, w3) + b3


if __name__ == "__main__":
    # Small config consistent with the module's __init__.
    cfgs = dict(joint_obs_dim=16, hidden_dim=32, action_dim=8, num_agent=2,
                lr=1e-3, epsilon=0.1, gamma=0.99, batch_size=8)
    A = cfgs["num_agent"]
    B = cfgs["batch_size"]
    D_in = cfgs["joint_obs_dim"]
    H = cfgs["hidden_dim"]
    D_out = cfgs["action_dim"]

    key = jax.random.PRNGKey(0)
    k_obs, k_par = jax.random.split(key)

    # obs is a list of per-agent tensors in the PyTorch module; stack to [A,B,D_in].
    obs_list = [jax.random.normal(jax.random.fold_in(k_obs, i), (B, D_in), jnp.float32)
                for i in range(A)]
    obs_stacked = jnp.stack(obs_list, axis=0)

    params = init_params(k_par, A, D_in, H, D_out)

    out = qnetwork_forward(obs_stacked, params)
    out = jax.block_until_ready(out)

    # The module returns a list of per-agent Q tensors.
    q_list = [out[i] for i in range(A)]

    ref = reference_forward(obs_stacked, params)
    assert out.shape == (A, B, D_out)
    # Tolerance loosened for the bf16 matmul path (f32 accumulate, f32 bias add).
    assert jnp.allclose(out, ref, atol=5e-2, rtol=5e-2)

    print("KERNEL_OK")
</pallas_src>

<mosaic_0001>
module attributes {stable_mosaic.version = 11 : i64} {
  func.func @_mlp_kernel(%arg0: memref<2x8x16xbf16, #tpu.memory_space<vmem>>, %arg1: memref<2x16x32xbf16, #tpu.memory_space<vmem>>, %arg2: memref<2x1x32xf32, #tpu.memory_space<vmem>>, %arg3: memref<2x32x32xbf16, #tpu.memory_space<vmem>>, %arg4: memref<2x1x32xf32, #tpu.memory_space<vmem>>, %arg5: memref<2x32x128xbf16, #tpu.memory_space<vmem>>, %arg6: memref<2x1x128xf32, #tpu.memory_space<vmem>>, %arg7: memref<2x8x128xf32, #tpu.memory_space<vmem>>) attributes {dimension_semantics = [], scalar_prefetch = 0 : i64, scratch_operands = 0 : i64, tpu.core_type = #tpu.core_type<tc>} {
    %c0 = arith.constant 0 : index
    %c0_0 = arith.constant 0 : index
    %c0_1 = arith.constant 0 : index
    %0 = vector.load %arg0[%c0, %c0_0, %c0_1] : memref<2x8x16xbf16, #tpu.memory_space<vmem>>, vector<1x8x16xbf16>
    %1 = vector.shape_cast %0 : vector<1x8x16xbf16> to vector<8x16xbf16>
    %c0_2 = arith.constant 0 : index
    %c0_3 = arith.constant 0 : index
    %c0_4 = arith.constant 0 : index
    %2 = vector.load %arg1[%c0_2, %c0_3, %c0_4] : memref<2x16x32xbf16, #tpu.memory_space<vmem>>, vector<1x16x32xbf16>
    %3 = vector.shape_cast %2 : vector<1x16x32xbf16> to vector<16x32xbf16>
    %cst = arith.constant dense<0.000000e+00> : vector<8x32xf32>
    %4 = tpu.matmul %1, %3, %cst {dimension_numbers = #tpu.dot_dimension_numbers<[1], [0], [0], [1], [0, 0, 1, 1], [], []>} : vector<8x16xbf16>, vector<16x32xbf16>, vector<8x32xf32> -> vector<8x32xf32>
    %c0_5 = arith.constant 0 : index
    %c0_6 = arith.constant 0 : index
    %c0_7 = arith.constant 0 : index
    %5 = vector.load %arg2[%c0_5, %c0_6, %c0_7] : memref<2x1x32xf32, #tpu.memory_space<vmem>>, vector<1x1x32xf32>
    %6 = vector.shape_cast %5 : vector<1x1x32xf32> to vector<1x32xf32>
    %7 = vector.broadcast %6 : vector<1x32xf32> to vector<8x32xf32>
    %8 = arith.addf %4, %7 : vector<8x32xf32>
    %cst_8 = arith.constant 0.000000e+00 : f32
    %9 = vector.broadcast %cst_8 : f32 to vector<8x32xf32>
    %10 = arith.maximumf %8, %9 : vector<8x32xf32>
    %11 = arith.truncf %10 : vector<8x32xf32> to vector<8x32xbf16>
    %c0_9 = arith.constant 0 : index
    %c0_10 = arith.constant 0 : index
    %c0_11 = arith.constant 0 : index
    %12 = vector.load %arg3[%c0_9, %c0_10, %c0_11] : memref<2x32x32xbf16, #tpu.memory_space<vmem>>, vector<1x32x32xbf16>
    %13 = vector.shape_cast %12 : vector<1x32x32xbf16> to vector<32x32xbf16>
    %cst_12 = arith.constant dense<0.000000e+00> : vector<8x32xf32>
    %14 = tpu.matmul %11, %13, %cst_12 {dimension_numbers = #tpu.dot_dimension_numbers<[1], [0], [0], [1], [0, 0, 1, 1], [], []>} : vector<8x32xbf16>, vector<32x32xbf16>, vector<8x32xf32> -> vector<8x32xf32>
    %c0_13 = arith.constant 0 : index
    %c0_14 = arith.constant 0 : index
    %c0_15 = arith.constant 0 : index
    %15 = vector.load %arg4[%c0_13, %c0_14, %c0_15] : memref<2x1x32xf32, #tpu.memory_space<vmem>>, vector<1x1x32xf32>
    %16 = vector.shape_cast %15 : vector<1x1x32xf32> to vector<1x32xf32>
    %17 = vector.broadcast %16 : vector<1x32xf32> to vector<8x32xf32>
    %18 = arith.addf %14, %17 : vector<8x32xf32>
    %cst_16 = arith.constant 0.000000e+00 : f32
    %19 = vector.broadcast %cst_16 : f32 to vector<8x32xf32>
    %20 = arith.maximumf %18, %19 : vector<8x32xf32>
    %21 = arith.truncf %20 : vector<8x32xf32> to vector<8x32xbf16>
    %c0_17 = arith.constant 0 : index
    %c0_18 = arith.constant 0 : index
    %c0_19 = arith.constant 0 : index
    %22 = vector.load %arg5[%c0_17, %c0_18, %c0_19] : memref<2x32x128xbf16, #tpu.memory_space<vmem>>, vector<1x32x128xbf16>
    %23 = vector.shape_cast %22 : vector<1x32x128xbf16> to vector<32x128xbf16>
    %cst_20 = arith.constant dense<0.000000e+00> : vector<8x128xf32>
    %24 = tpu.matmul %21, %23, %cst_20 {dimension_numbers = #tpu.dot_dimension_numbers<[1], [0], [0], [1], [0, 0, 1, 1], [], []>} : vector<8x32xbf16>, vector<32x128xbf16>, vector<8x128xf32> -> vector<8x128xf32>
    %c0_21 = arith.constant 0 : index
    %c0_22 = arith.constant 0 : index
    %c0_23 = arith.constant 0 : index
    %25 = vector.load %arg6[%c0_21, %c0_22, %c0_23] : memref<2x1x128xf32, #tpu.memory_space<vmem>>, vector<1x1x128xf32>
    %26 = vector.shape_cast %25 : vector<1x1x128xf32> to vector<1x128xf32>
    %27 = vector.broadcast %26 : vector<1x128xf32> to vector<8x128xf32>
    %28 = arith.addf %24, %27 : vector<8x128xf32>
    %c0_24 = arith.constant 0 : index
    %c0_25 = arith.constant 0 : index
    %c0_26 = arith.constant 0 : index
    %29 = vector.load %arg7[%c0_24, %c0_25, %c0_26] : memref<2x8x128xf32, #tpu.memory_space<vmem>>, vector<1x8x128xf32>
    %30 = vector.shape_cast %29 : vector<1x8x128xf32> to vector<8x128xf32>
    %31 = vector.shape_cast %28 : vector<8x128xf32> to vector<1x8x128xf32>
    tpu.vector_store %arg7[%c0_24, %c0_25, %c0_26], %31 {strides = array<i32>} : memref<2x8x128xf32, #tpu.memory_space<vmem>>, vector<1x8x128xf32>,
    %c1 = arith.constant 1 : index
    %c0_27 = arith.constant 0 : index
    %c0_28 = arith.constant 0 : index
    %32 = vector.load %arg0[%c1, %c0_27, %c0_28] : memref<2x8x16xbf16, #tpu.memory_space<vmem>>, vector<1x8x16xbf16>
    %33 = vector.shape_cast %32 : vector<1x8x16xbf16> to vector<8x16xbf16>
    %c1_29 = arith.constant 1 : index
    %c0_30 = arith.constant 0 : index
    %c0_31 = arith.constant 0 : index
    %34 = vector.load %arg1[%c1_29, %c0_30, %c0_31] : memref<2x16x32xbf16, #tpu.memory_space<vmem>>, vector<1x16x32xbf16>
    %35 = vector.shape_cast %34 : vector<1x16x32xbf16> to vector<16x32xbf16>
    %cst_32 = arith.constant dense<0.000000e+00> : vector<8x32xf32>
    %36 = tpu.matmul %33, %35, %cst_32 {dimension_numbers = #tpu.dot_dimension_numbers<[1], [0], [0], [1], [0, 0, 1, 1], [], []>} : vector<8x16xbf16>, vector<16x32xbf16>, vector<8x32xf32> -> vector<8x32xf32>
    %c1_33 = arith.constant 1 : index
    %c0_34 = arith.constant 0 : index
    %c0_35 = arith.constant 0 : index
    %37 = vector.load %arg2[%c1_33, %c0_34, %c0_35] : memref<2x1x32xf32, #tpu.memory_space<vmem>>, vector<1x1x32xf32>
    %38 = vector.shape_cast %37 : vector<1x1x32xf32> to vector<1x32xf32>
    %39 = vector.broadcast %38 : vector<1x32xf32> to vector<8x32xf32>
    %40 = arith.addf %36, %39 : vector<8x32xf32>
    %cst_36 = arith.constant 0.000000e+00 : f32
    %41 = vector.broadcast %cst_36 : f32 to vector<8x32xf32>
    %42 = arith.maximumf %40, %41 : vector<8x32xf32>
    %43 = arith.truncf %42 : vector<8x32xf32> to vector<8x32xbf16>
    %c1_37 = arith.constant 1 : index
    %c0_38 = arith.constant 0 : index
    %c0_39 = arith.constant 0 : index
    %44 = vector.load %arg3[%c1_37, %c0_38, %c0_39] : memref<2x32x32xbf16, #tpu.memory_space<vmem>>, vector<1x32x32xbf16>
    %45 = vector.shape_cast %44 : vector<1x32x32xbf16> to vector<32x32xbf16>
    %cst_40 = arith.constant dense<0.000000e+00> : vector<8x32xf32>
    %46 = tpu.matmul %43, %45, %cst_40 {dimension_numbers = #tpu.dot_dimension_numbers<[1], [0], [0], [1], [0, 0, 1, 1], [], []>} : vector<8x32xbf16>, vector<32x32xbf16>, vector<8x32xf32> -> vector<8x32xf32>
    %c1_41 = arith.constant 1 : index
    %c0_42 = arith.constant 0 : index
    %c0_43 = arith.constant 0 : index
    %47 = vector.load %arg4[%c1_41, %c0_42, %c0_43] : memref<2x1x32xf32, #tpu.memory_space<vmem>>, vector<1x1x32xf32>
    %48 = vector.shape_cast %47 : vector<1x1x32xf32> to vector<1x32xf32>
    %49 = vector.broadcast %48 : vector<1x32xf32> to vector<8x32xf32>
    %50 = arith.addf %46, %49 : vector<8x32xf32>
    %cst_44 = arith.constant 0.000000e+00 : f32
    %51 = vector.broadcast %cst_44 : f32 to vector<8x32xf32>
    %52 = arith.maximumf %50, %51 : vector<8x32xf32>
    %53 = arith.truncf %52 : vector<8x32xf32> to vector<8x32xbf16>
    %c1_45 = arith.constant 1 : index
    %c0_46 = arith.constant 0 : index
    %c0_47 = arith.constant 0 : index
    %54 = vector.load %arg5[%c1_45, %c0_46, %c0_47] : memref<2x32x128xbf16, #tpu.memory_space<vmem>>, vector<1x32x128xbf16>
    %55 = vector.shape_cast %54 : vector<1x32x128xbf16> to vector<32x128xbf16>
    %cst_48 = arith.constant dense<0.000000e+00> : vector<8x128xf32>
    %56 = tpu.matmul %53, %55, %cst_48 {dimension_numbers = #tpu.dot_dimension_numbers<[1], [0], [0], [1], [0, 0, 1, 1], [], []>} : vector<8x32xbf16>, vector<32x128xbf16>, vector<8x128xf32> -> vector<8x128xf32>
    %c1_49 = arith.constant 1 : index
    %c0_50 = arith.constant 0 : index
    %c0_51 = arith.constant 0 : index
    %57 = vector.load %arg6[%c1_49, %c0_50, %c0_51] : memref<2x1x128xf32, #tpu.memory_space<vmem>>, vector<1x1x128xf32>
    %58 = vector.shape_cast %57 : vector<1x1x128xf32> to vector<1x128xf32>
    %59 = vector.broadcast %58 : vector<1x128xf32> to vector<8x128xf32>
    %60 = arith.addf %56, %59 : vector<8x128xf32>
    %c1_52 = arith.constant 1 : index
    %c0_53 = arith.constant 0 : index
    %c0_54 = arith.constant 0 : index
    %61 = vector.load %arg7[%c1_52, %c0_53, %c0_54] : memref<2x8x128xf32, #tpu.memory_space<vmem>>, vector<1x8x128xf32>
    %62 = vector.shape_cast %61 : vector<1x8x128xf32> to vector<8x128xf32>
    %63 = vector.shape_cast %60 : vector<8x128xf32> to vector<1x8x128xf32>
    tpu.vector_store %arg7[%c1_52, %c0_53, %c0_54], %63 {strides = array<i32>} : memref<2x8x128xf32, #tpu.memory_space<vmem>>, vector<1x8x128xf32>,
    return
  }
}

</mosaic_0001>

<bundles_post_ra>
// kernel: tpu_custom_call.1
= control target key start
LH: loop header
LB: loop body
LE: loop exit
PB: predicated region body
PF: predicated region fallthrough
CT: control target
= control target key end

     0   :  { %12 = vsyncpa [#allocation3], 0  ;;  %s675_s0 = inlined_call_operand.hbm [shape: bf16[2,8,16], index: 0, kind: input, shape index: {}]   ;;  %s676_s1 = inlined_call_operand.hbm [shape: bf16[2,16,32], index: 1, kind: input, shape index: {}]   ;;  %s677_s2 = inlined_call_operand.hbm [shape: f32[2,1,32], index: 2, kind: input, shape index: {}]   ;;  %s678_s3 = inlined_call_operand.hbm [shape: bf16[2,32,32], index: 3, kind: input, shape index: {}]   ;;  %s679_s4 = inlined_call_operand.vmem [shape: f32[2,1,32], index: 4, kind: input, shape index: {}]   ;;  %s680_s5 = inlined_call_operand.hbm [shape: bf16[2,32,128], index: 5, kind: input, shape index: {}]   ;;  %s681_s6 = inlined_call_operand.vmem [shape: f32[2,1,128], index: 6, kind: input, shape index: {}]   ;;  %s682_s7 = inlined_call_operand.hbm [shape: f32[2,8,128], index: 7, kind: output, shape index: {}]  }
   0x1   :  { %13 = vsyncpa [#allocation6], 0 }
   0x2   :  { %14 = vsyncpa [#allocation9], 0 }
   0x3   :  { %15 = vsyncpa [#allocation4], 0  ;;  %s33_s26 = sshll.u32 %s676_s1, 4  ;;  %s577_s27 = smov [#allocation5]   ;;  %s34_s26 = int_to_ptr.hbm [resolvable:$true] %s33_s26 }
   0x4   :  { %s35_s28 = sshll.u32 %s577_s27, 4  ;;  %s59_s8 = sshll.u32 %s678_s3, 4  ;;  %s36_s28 = int_to_ptr.vmem [resolvable:$true] %s35_s28  ;;  %s60_s8 = int_to_ptr.hbm [resolvable:$true] %s59_s8 }
   0x5   :  { %s578_s9 = smov 64   ;;  %s579_s10 = smov 4  }
   0x6   :  { %41 = dma.hbm_to_vmem [thread:$0]  %s34_s26, 256, %s36_s28, [#allocation6], %s578_s9, %s578_s9, %s579_s10  }
   0x7   :  { %s580_s11 = smov [#allocation8]   ;;  %s20_s1 = sshll.u32 %s675_s0, 4  ;;  %s21_s1 = int_to_ptr.hbm [resolvable:$true] %s20_s1 }
   0x8   :  { %s61_s12 = sshll.u32 %s580_s11, 4  ;;  %s46_s16 = sshll.u32 %s677_s2, 4  ;;  %s62_s12 = int_to_ptr.vmem [resolvable:$true] %s61_s12  ;;  %s47_s16 = int_to_ptr.hbm [resolvable:$true] %s46_s16 }
   0x9   :  { %67 = dma.hbm_to_vmem [thread:$0]  %s60_s8, 512, %s62_s12, [#allocation9], %s578_s9, %s578_s9, %s579_s10  }
   0xa   :  { %s581_s17 = smov [#allocation2]   ;;  %s582_s19 = smov [#allocation7]  }
   0xb   :  { %s22_s18 = sshll.u32 %s581_s17, 4  ;;  %s48_s0 = sshll.u32 %s582_s19, 4  ;;  %s23_s18 = int_to_ptr.vmem [resolvable:$true] %s22_s18  ;;  %s49_s0 = int_to_ptr.vmem [resolvable:$true] %s48_s0 }
   0xc   :  { %28 = dma.hbm_to_vmem [thread:$0]  %s21_s1, 128, %s23_s18, [#allocation3], %s578_s9, %s578_s9, %s579_s10  }
   0xd   :  { %s583_s20 = smov 16   ;;  %s584_s21 = smov 1  }
   0xe   :  { %54 = dma.hbm_to_vmem [thread:$0]  %s47_s16, 32, %s49_s0, [#allocation6], %s583_s20, %s583_s20, %s584_s21  }
   0xf   :  { %s74_s24 = sshll.u32 %s680_s5, 4  ;;  %s585_s2 = smov [#allocation10]   ;;  %s75_s24 = int_to_ptr.hbm [resolvable:$true] %s74_s24 }
  0x10   :  { %s76_s25 = sshll.u32 %s585_s2, 4  ;;  %s77_s25 = int_to_ptr.vmem [resolvable:$true] %s76_s25 }
  0x11   :  { %82 = dma.hbm_to_vmem [thread:$0]  %s75_s24, 512, %s77_s25, [#allocation9], %s578_s9, %s578_s9, %s579_s10  }
  0x12   :  { %569 = dma.done.wait [#allocation3], 128  }
  0x13   :  { %570 = vsyncadd [#allocation3], 4294967168 }
  0x14   :  { %571 = dma.done.wait [#allocation6], 288  }
  0x15   :  { %572 = vsyncadd [#allocation6], 4294967008 }
  0x16   :  { %573 = dma.done.wait [#allocation9], 1024  }
  0x17   :  { %574 = vsyncadd [#allocation9], 4294966272  ;;  %v397_v0 = vld [vmem:[#allocation5] sm:$0xff]  ;;  %v402_v1 = vld [vmem:[#allocation5 + $0x8] sm:$0xff]  ;;  %vm119_vm0 = vcmask 130048   ;;  %vm158_vm1 = vcmask 261120  }
  0x18   :  { %v106_v2 = vld [vmem:[#allocation2] sm:$0xf]  ;;  %v404_v3 = vld [vmem:[#allocation8 + $0x18] sm:$0xff]  ;;  %130 = vmatpush.bf16.msra.mxu0 %v397_v0  ;;  %240 = vmatpush.bf16.msra.mxu3 %v402_v1  ;;  %v215_v4 = vld [vmem:[#allocation2 + $0x4] sm:$0xf]  ;;  %s586_s9 = smov [#allocation11]  }
  0x19   :  { %v399_v5 = vld [vmem:[#allocation8 + $0x8] sm:$0xff]  ;;  %v398_v6 = vld [vmem:[#allocation8] sm:$0xff]  ;;  %v403_v7 = vld [vmem:[#allocation8 + $0x10] sm:$0xff]  ;;  %s332_s10 = sshll.u32 %s586_s9, 4  ;;  %s334_s13 = sshll.u32 %s682_s7, 4  ;;  %s333_s10 = int_to_ptr.vmem [resolvable:$true] %s332_s10  ;;  %s335_s13 = int_to_ptr.hbm [resolvable:$true] %s334_s13 }
  0x1a   :  { %168 = vmatpush.bf16.msra.mxu1 %v399_v5  ;;  %v406_v8 = vld [vmem:[#allocation10 + $0x18] sm:$0xff]  ;;  %v401_v21 = vld [vmem:[#allocation10 + $0x8] sm:$0xff]  ;;  %v400_v22 = vld [vmem:[#allocation10] sm:$0xff]  ;;  %s587_s14 = smov 128   ;;  %s588_s1 = smov 8  }
  0x1b   :  { %353 = vmatmul.msk.bf16.vlgmr.msra.gmra.mxu0 %vm119_vm0, %v106_v2  ;;  %376 = vmatmul.msk.bf16.vlgmr.msra.gmra.mxu3 %vm119_vm0, %v215_v4  ;;  %v419_v9 = vld [vmem:[#allocation7] ss:$0 sm:$0xff]  ;;  %v420_v13 = vld [vmem:[#allocation7 + $0x1] ss:$0 sm:$0xff]  ;;  %v405_v23 = vld [vmem:[#allocation10 + $0x10] sm:$0xff] }
  0x1c   :  { %279 = vmatpush.bf16.msrb.mxu0 %v404_v3  ;;  %319 = vmatpush.bf16.msrb.mxu3 %v406_v8  ;;  %v421_v24 = vld [vmem:[%s679_s4] ss:$0 sm:$0xff]  ;;  %v422_v28 = vld [vmem:[%s679_s4 + $0x1] ss:$0 sm:$0xff] }
  0x1d   :  { %206 = vmatpush.bf16.msra.mxu2 %v401_v21  ;;  %v423_v36 = vld [vmem:[%s681_s6] ss:$0 sm:$0xff]  ;;  %v424_v39 = vld [vmem:[%s681_s6 + $0x1] ss:$0 sm:$0xff] }
  0x1e   :  { %169 = vmatpush.bf16.msra.mxu1 %v398_v6 }
  0x20   :  { %280 = vmatpush.bf16.msrb.mxu0 %v403_v7  ;;  %320 = vmatpush.bf16.msrb.mxu3 %v405_v23 }
  0x21   :  { %207 = vmatpush.bf16.msra.mxu2 %v400_v22 }
  0x98   :  { %v132_v10 = vpop.f32.mrf.mxu0 }
  0x99   :  { %v133_v11 = vadd.f32 %v419_v9, %v132_v10 }
  0x9b   :  { %v136_v12 = vmax.f32 %v133_v11, 0.0 }
  0x9d   :  { %v137_v14 = vpack.c.bf16 %v136_v12, %v136_v12 }
  0x9e   :  { %v242_v15 = vpop.f32.mrf.mxu3 }
  0x9f   :  { %v243_v16 = vadd.f32 %v420_v13, %v242_v15  ;;  %362 = vmatmul.msk.bf16.vlgmr.msra.gmra.mxu1 %vm158_vm1, %v137_v14 }
  0xa0   :  { %v134_v17 = vpop.f32.mrf.mxu0 }
  0xa1   :  { %v246_v18 = vmax.f32 %v243_v16, 0.0 }
  0xa3   :  { %v247_v19 = vpack.c.bf16 %v246_v18, %v246_v18 }
  0xa5   :  { %386 = vmatmul.msk.bf16.vlgmr.msrb.gmra.mxu0 %vm158_vm1, %v247_v19 }
  0xa6   :  { %v244_v20 = vpop.f32.mrf.mxu3 }
 0x11c   :  { %v171_v25 = vpop.f32.mrf.mxu1 }
 0x11d   :  { %v172_v26 = vadd.f32 %v421_v24, %v171_v25 }
 0x11f   :  { %v175_v27 = vmax.f32 %v172_v26, 0.0 }
 0x121   :  { %v176_v29 = vpack.c.bf16 %v175_v27, %v175_v27 }
 0x122   :  { %v282_v30 = vpop.f32.mrf.mxu0 }
 0x123   :  { %v283_v31 = vadd.f32 %v422_v28, %v282_v30  ;;  %371 = vmatmul.msk.bf16.vlgmr.msra.gmra.mxu2 %vm158_vm1, %v176_v29 }
 0x124   :  { %v173_v32 = vpop.f32.mrf.mxu1 }
 0x125   :  { %v286_v33 = vmax.f32 %v283_v31, 0.0 }
 0x127   :  { %v287_v34 = vpack.c.bf16 %v286_v33, %v286_v33 }
 0x129   :  { %396 = vmatmul.msk.bf16.vlgmr.msrb.gmra.mxu3 %vm158_vm1, %v287_v34 }
 0x12a   :  { %v284_v35 = vpop.f32.mrf.mxu0 }
 0x1a6   :  { %v209_v37 = vpop.f32.mrf.mxu2 }
 0x1a7   :  { %v210_v38 = vadd.f32 %v423_v36, %v209_v37 }
 0x1a9   :  { %213 = vst [vmem:[#allocation11] sm:$0xff] %v210_v38 }
 0x1ac   :  { %v322_v40 = vpop.f32.mrf.mxu3 }
 0x1ad   :  { %v323_v41 = vadd.f32 %v424_v39, %v322_v40 }
 0x1ae   :  { %v211_v42 = vpop.f32.mrf.mxu2 }
 0x1af   :  { %327 = vst [vmem:[#allocation11 + $0x8] sm:$0xff] %v323_v41 }
 0x1b0   :  { %340 = dma.vmem_to_hbm [thread:$0]  %s333_s10, 256, %s335_s13, [#allocation4], %s587_s14, %s587_s14, %s588_s1  }
 0x1b4   :  { %v324_v43 = vpop.f32.mrf.mxu3 }
 0x1b5   :  { %575 = dma.done.wait [#allocation4], 256  }
 0x1b6   :  { %576 = vsyncadd [#allocation4], 4294967040 }
 0x1b7   :  { %345 = vsyncpa [#allocation3], 1 }
 0x1b8   :  { %346 = vsyncpa [#allocation6], 1 }
 0x1b9   :  { %347 = vsyncpa [#allocation9], 1 }
 0x1ba   :  { %348 = vsyncpa [#allocation4], 1 }

</bundles_post_ra>
